<compile_context>
chip_gen: v7x
topology: tpu7x:2x2x1
jax: 0.10.0
libtpu: 0.0.40
codegen_flags: <defaults>
</compile_context>

<pallas_src>
import math

import jax
import jax.numpy as jnp
from jax.experimental import pallas as pl
from jax.experimental.pallas import tpu as pltpu


def _round_up(x, m):
    return ((x + m - 1) // m) * m


def _fourier_kernel(x_ref, tbl_ref, o_ref):
    # x_ref:   (TILE_N, 1)      input values
    # tbl_ref: (2, C_pad) f32   row 0 = [2*pi*f, 2*pi*f, 0-pad]
    #                           row 1 = [pi/2 ... pi/2, 0 ... 0, 0-pad]
    # o_ref:   (TILE_N, C_pad)  output tile (cos half | sin half | pad)
    x = x_ref[...].astype(jnp.float32)        # (TILE_N, 1)
    f = tbl_ref[0:1, :]                       # (1, C_pad) f32
    off = tbl_ref[1:2, :]                     # (1, C_pad) f32
    # sin(theta + pi/2) == cos(theta); padded lanes give sin(0+0) = 0.
    o_ref[...] = jnp.sin(x * f + off).astype(o_ref.dtype)


def fourier_embedding(x, freqs, tile_n=512):
    """x: (N,) array, freqs: (C/2,) array. Returns (N, C) in x.dtype."""
    n = x.shape[0]
    c_half = freqs.shape[0]
    c = 2 * c_half
    out_dtype = x.dtype
    itemsize = jnp.dtype(out_dtype).itemsize

    # --- Frequency / phase-offset table (2, C_pad), float32 -----------------
    # Torch parity: (2*pi*freqs).to(x.dtype), then promoted once to f32 for the
    # in-kernel trig (the kernel itself never re-casts per tile).
    f_scaled = ((2.0 * math.pi) * freqs.astype(jnp.float32)).astype(out_dtype)
    f_scaled = f_scaled.astype(jnp.float32)
    f_cat = jnp.concatenate([f_scaled, f_scaled])                      # (C,)
    off = jnp.concatenate([
        jnp.full((c_half,), 0.5 * math.pi, dtype=jnp.float32),          # cos half
        jnp.zeros((c_half,), dtype=jnp.float32),                        # sin half
    ])

    c_pad = _round_up(c, 128)                 # pad TOTAL width only
    if c_pad != c:
        f_cat = jnp.pad(f_cat, (0, c_pad - c))
        off = jnp.pad(off, (0, c_pad - c))
    tbl = jnp.stack([f_cat, off])             # (2, C_pad) f32

    # --- Row tiling ----------------------------------------------------------
    sub = max(8, 32 // itemsize)              # 8 for f32, 16 for bf16, ...
    tile_req = _round_up(tile_n, sub)
    # Aim for >= ~4 grid steps (pipeline depth; lets v7x shard rows over 2 TCs)
    # without dropping below one sublane group.
    tile_fit = max(sub, _round_up(pl.cdiv(n, 4), sub))
    # VMEM guard (v5e 16 MiB scoped default): keep f32 temporaries + the
    # double-buffered output block to ~<12 MiB -> cap tile rows for huge C.
    budget_elems = (8 * 1024 * 1024) // 4     # ~8 MiB of f32 work elements
    max_rows = max(sub, ((budget_elems // c_pad) // sub) * sub)
    tile_n_eff = max(sub, min(tile_req, tile_fit, max_rows))

    n_pad = _round_up(n, tile_n_eff)
    x2d = x.reshape(n, 1)
    if n_pad != n:
        x2d = jnp.pad(x2d, ((0, n_pad - n), (0, 0)))

    grid = (n_pad // tile_n_eff,)

    out = pl.pallas_call(
        _fourier_kernel,
        out_shape=jax.ShapeDtypeStruct((n_pad, c_pad), out_dtype),
        grid_spec=pltpu.PrefetchScalarGridSpec(
            num_scalar_prefetch=0,
            grid=grid,
            in_specs=[
                pl.BlockSpec((tile_n_eff, 1), lambda i: (i, 0)),
                pl.BlockSpec((2, c_pad), lambda i: (0, 0)),
            ],
            out_specs=pl.BlockSpec((tile_n_eff, c_pad), lambda i: (i, 0)),
        ),
        compiler_params=pltpu.CompilerParams(
            dimension_semantics=("parallel",),
        ),
        cost_estimate=pl.CostEstimate(
            flops=2 * n_pad * c_pad,                       # mul + add per lane
            transcendentals=n_pad * c_pad,                 # single sin per lane
            bytes_accessed=(n_pad * c_pad + n_pad) * itemsize + 2 * c_pad * 4,
        ),
    )(x2d, tbl)

    # cos|sin halves are contiguous in the first C lanes -> plain slice, no concat.
    if c_pad != c or n_pad != n:
        return out[:n, :c]
    return out


def fourier_embedding_ref(x, freqs):
    # Matches torch: x.ger((2*pi*freqs).to(x.dtype)); cat([cos, sin], dim=1)
    scaled = ((2.0 * math.pi) * freqs).astype(x.dtype)
    phase = jnp.outer(x, scaled)
    return jnp.concatenate([jnp.cos(phase), jnp.sin(phase)], axis=1)


if __name__ == "__main__":
    num_channels = 32
    scale = 16.0
    batch = 8

    key = jax.random.PRNGKey(0)
    k_freqs, k_x = jax.random.split(key)

    # Deterministic "buffer" init mirroring torch.randn(num_channels // 2) * scale
    freqs = jax.random.normal(k_freqs, (num_channels // 2,), dtype=jnp.float32) * scale
    # Example input: a 1-D vector of "timesteps"
    x = jax.random.uniform(k_x, (batch,), dtype=jnp.float32)

    out = fourier_embedding(x, freqs)
    out = jax.block_until_ready(out)

    ref = fourier_embedding_ref(x, freqs)
    assert out.shape == (batch, num_channels), out.shape
    # Slightly looser tolerance: cos is computed as sin(theta + pi/2), which
    # rounds the phase add in f32 (error << 1e-4 for these magnitudes).
    assert jnp.allclose(out, ref, atol=1e-4, rtol=1e-4), "mismatch vs reference"

    print("KERNEL_OK")
</pallas_src>

<mosaic_0001>
module attributes {stable_mosaic.version = 11 : i64} {
  func.func @_fourier_kernel(%arg0: i32, %arg1: memref<8x1xf32, #tpu.memory_space<vmem>>, %arg2: memref<2x128xf32, #tpu.memory_space<vmem>>, %arg3: memref<8x128xf32, #tpu.memory_space<vmem>>) attributes {dimension_semantics = [#tpu.dimension_semantics<parallel>], iteration_bounds = array<i64: 1>, scalar_prefetch = 0 : i64, scratch_operands = 0 : i64, tpu.core_type = #tpu.core_type<tc>, window_params = [{transform_indices = @transform_0, window_bounds = array<i64: 8, 1>}, {pipeline_mode = #tpu.pipeline_mode<synchronous>, transform_indices = @transform_1, window_bounds = array<i64: 2, 128>}, {transform_indices = @transform_2, window_bounds = array<i64: 8, 128>}]} {
    %c0 = arith.constant 0 : index
    %c0_0 = arith.constant 0 : index
    %0 = vector.load %arg1[%c0, %c0_0] : memref<8x1xf32, #tpu.memory_space<vmem>>, vector<8x1xf32>
    %c0_1 = arith.constant 0 : index
    %c0_2 = arith.constant 0 : index
    %1 = vector.load %arg2[%c0_1, %c0_2] : memref<2x128xf32, #tpu.memory_space<vmem>>, vector<1x128xf32>
    %c1 = arith.constant 1 : index
    %c0_3 = arith.constant 0 : index
    %2 = vector.load %arg2[%c1, %c0_3] : memref<2x128xf32, #tpu.memory_space<vmem>>, vector<1x128xf32>
    %3 = vector.broadcast %0 : vector<8x1xf32> to vector<8x128xf32>
    %4 = vector.broadcast %1 : vector<1x128xf32> to vector<8x128xf32>
    %5 = arith.mulf %3, %4 : vector<8x128xf32>
    %6 = vector.broadcast %2 : vector<1x128xf32> to vector<8x128xf32>
    %7 = arith.addf %5, %6 : vector<8x128xf32>
    %8 = math.sin %7 : vector<8x128xf32>
    %c0_4 = arith.constant 0 : index
    %c0_5 = arith.constant 0 : index
    %9 = vector.load %arg3[%c0_4, %c0_5] : memref<8x128xf32, #tpu.memory_space<vmem>>, vector<8x128xf32>
    tpu.vector_store %arg3[%c0_4, %c0_5], %8 {strides = array<i32>} : memref<8x128xf32, #tpu.memory_space<vmem>>, vector<8x128xf32>,
    return
  }
  func.func @transform_0(%arg0: i32) -> (i32, i32) {
    %c0_i32 = arith.constant 0 : i32
    %c0_i32_0 = arith.constant 0 : i32
    return %arg0, %c0_i32 : i32, i32
  }
  func.func @transform_1(%arg0: i32) -> (i32, i32) {
    %c0_i32 = arith.constant 0 : i32
    %c0_i32_0 = arith.constant 0 : i32
    %c0_i32_1 = arith.constant 0 : i32
    return %c0_i32, %c0_i32_0 : i32, i32
  }
  func.func @transform_2(%arg0: i32) -> (i32, i32) {
    %c0_i32 = arith.constant 0 : i32
    %c0_i32_0 = arith.constant 0 : i32
    return %arg0, %c0_i32 : i32, i32
  }
}

</mosaic_0001>

<bundles_post_ra>
// kernel: tpu_custom_call.1
= control target key start
LH: loop header
LB: loop body
LE: loop exit
PB: predicated region body
PF: predicated region fallthrough
CT: control target
= control target key end

     0   :  { %v196_v1 = vmov 0   ;;  %s261_s0 = inlined_call_operand.vmem [shape: f32[8,1], index: 0, kind: input, shape index: {}]   ;;  %s262_s1 = inlined_call_operand.vmem [shape: f32[2,128], index: 1, kind: input, shape index: {}]   ;;  %s263_s2 = inlined_call_operand.hbm [shape: f32[8,128], index: 2, kind: output, shape index: {}]  }
   0x1   :  { %v12_v0 = vld [vmem:[%s261_s0] sm:$0xff]  ;;  %167 = vset.pattern.permute.xlu0 %v196_v1 }
   0x2   :  { %17 = vperm.xlu0 %167, %v12_v0  }
   0x3   :  { %7 = vsyncpa [#allocation3], 0  ;;  %v149_v2 = vld [vmem:[%s262_s1] ss:$0 sm:$0xff]  ;;  %v150_v3 = vld [vmem:[%s262_s1 + $0x1] ss:$0 sm:$0xff] }
   0x4   :  { %v197_v18 = vmov 2102212464   ;;  %v198_v20 = vmov 920167782   ;;  %v199_v24 = vmov 1326507024  }
   0x5   :  { %v200_v26 = vmov 683565275   ;;  %v201_v28 = vmov 2475754826   ;;  %v202_v31 = vmov 2131351028  }
   0x6   :  { %s203_s0 = smov [#allocation2]  }
   0x7   :  { %s141_s1 = sshll.u32 %s203_s0, 4  ;;  %s142_s1 = int_to_ptr.vmem [resolvable:$true] %s141_s1 }
   0x8   :  { %s172_s15 = scalar_lea.vmem %s142_s1, 128  ;;  %p177_p1 = scmp.lt.s32.totalorder %s142_s1, %s142_s1 }
   0x9   :  { %p173_p0 = scmp.ne.s32.totalorder %s142_s1, %s172_s15  ;;  %p178_p2 = scmp.lt.s32.totalorder %s172_s15, %s172_s15 }
   0xb   :  { %p179_p3 = por %p178_p2, %p177_p1 }
   0xd   :  { %p180_p4 = pnand %p179_p3, %p173_p0 }
  0x81   :  { %v18_v4 = vpop.permute.xlu0 %17 }
  0x82   :  { %v24_v5 = vmul.f32 %v149_v2, %v18_v4 }
  0x84   :  { %v228_v6 = vadd.f32 %v150_v3, %v24_v5 }
  0x86   :  { %v33_v7 = vand.u32 2139095040, %v228_v6  ;;  %v30_v8 = vand.u32 2147483647, %v228_v6  ;;  %vm32_vm7 = vcmp.lt.s32.totalorder %v228_v6, 0  ;;  %vm122_vm12 = vweird.f32 %v228_v6 }
  0x88   :  { %v34_v9 = vshrl.u32 %v33_v7, 23  ;;  %v37_v11 = vand.u32 8388607, %v30_v8  ;;  %vm31_vm8 = vcmp.le.f32.partialorder %v30_v8, 0.7853982 }
  0x8a   :  { %v151_v10 = vadd.s32 4294967169, %v34_v9  ;;  %v38_v14 = vor.u32 8388608, %v37_v11 }
  0x8c   :  { %v40_v12 = vadd.s32 1, %v151_v10  ;;  %v78_v22 = vshll.u32 %v38_v14, 8 }
  0x8e   :  { %vm41_vm0 = vcmp.gt.s32.totalorder %v40_v12, 0 }
  0x8f   :  { %v42_v13 = vsel %vm41_vm0, %v40_v12, 0 }
  0x90   :  { %v44_v15 = vand.u32 31, %v42_v13  ;;  %v43_v16 = vshrl.u32 %v42_v13, 5 }
  0x92   :  { %v45_v17 = vsub.s32 32, %v44_v15  ;;  %v56_v19 = vshll.u32 %v197_v18, %v44_v15  ;;  %v59_v21 = vshll.u32 %v198_v20, %v44_v15  ;;  %v47_v27 = vshll.u32 %v200_v26, %v44_v15 }
  0x93   :  { %v50_v30 = vshll.u32 %v201_v28, %v44_v15  ;;  %v53_v33 = vshll.u32 %v202_v31, %v44_v15  ;;  %vm65_vm1 = vcmp.lt.s32.totalorder %v43_v16, 4  ;;  %vm62_vm2 = vcmp.lt.s32.totalorder %v43_v16, 1 }
  0x94   :  { %v57_v23 = vshrl.u32 %v198_v20, %v45_v17  ;;  %v60_v25 = vshrl.u32 %v199_v24, %v45_v17  ;;  %v48_v29 = vshrl.u32 %v201_v28, %v45_v17  ;;  %v51_v32 = vshrl.u32 %v202_v31, %v45_v17 }
  0x95   :  { %v54_v34 = vshrl.u32 %v197_v18, %v45_v17  ;;  %v46_v38 = vshrl.u32 %v200_v26, %v45_v17  ;;  %vm63_vm3 = vcmp.lt.s32.totalorder %v43_v16, 2  ;;  %vm64_vm4 = vcmp.lt.s32.totalorder %v43_v16, 3 }
  0x96   :  { %v58_v35 = vor.u32 %v57_v23, %v56_v19  ;;  %v61_v36 = vor.u32 %v60_v25, %v59_v21  ;;  %v49_v37 = vor.u32 %v48_v29, %v47_v27  ;;  %v52_v39 = vor.u32 %v51_v32, %v50_v30 }
  0x97   :  { %v55_v40 = vor.u32 %v54_v34, %v53_v33 }
  0x98   :  { %v71_v41 = vsel %vm65_vm1, %v58_v35, 920167782  ;;  %v75_v42 = vsel %vm65_vm1, %v61_v36, 1326507024  ;;  %v70_v44 = vsel %vm62_vm2, %v49_v37, %v52_v39  ;;  %v66_v47 = vsel %vm62_vm2, %v46_v38, %v49_v37 }
  0x99   :  { %v67_v43 = vsel %vm65_vm1, %v55_v40, 2102212464  ;;  %v72_v45 = vsel %vm64_vm4, %v55_v40, %v71_v41  ;;  %v74_v46 = vsel %vm62_vm2, %v52_v39, %v55_v40  ;;  %v76_v50 = vsel %vm64_vm4, %v58_v35, %v75_v42 }
  0x9a   :  { %v68_v48 = vsel %vm64_vm4, %v52_v39, %v67_v43  ;;  %v73_v49 = vsel %vm63_vm3, %v70_v44, %v72_v45  ;;  %v77_v51 = vsel %vm63_vm3, %v74_v46, %v76_v50 }
  0x9b   :  { %v234_v52 = vmul.u32.u64.low %v78_v22, %v73_v49  ;;  %v235_v53 = vmul.u32.u64.high %v78_v22, %v73_v49, %v234_v52  ;;  %v237_v54 = vmul.u32.u64.low %v78_v22, %v77_v51  ;;  %v238_v55 = vmul.u32.u64.high %v78_v22, %v77_v51, %v237_v54 }
  0x9c   :  { %v69_v56 = vsel %vm63_vm3, %v66_v47, %v68_v48 }
  0x9d   :  { %v88_v57 = vadd.s32 1, %v235_v53  ;;  %v85_v58 = vmul.u32 %v78_v22, %v69_v56  ;;  %vm87_vm5 = vc.u32 %v238_v55, %v234_v52  ;;  %v86_v7 = vadd.s32 %v234_v52, %v238_v55 }
  0x9f   :  { %v89_v59 = vsel %vm87_vm5, %v88_v57, %v235_v53 }
  0xa0   :  { %v90_v60 = vadd.s32 %v89_v59, %v85_v58 }
  0xa2   :  { %v91_v61 = vadd.s32 536870912, %v90_v60 }
  0xa4   :  { %v92_v62 = vshrl.u32 %v91_v61, 30 }
  0xa6   :  { %v93_v63 = vshll.u32 %v92_v62, 30  ;;  %v116_v20 = vsub.s32 4, %v92_v62 }
  0xa8   :  { %v94_v0 = vsub.s32 %v90_v60, %v93_v63  ;;  %v117_v23 = vsel %vm32_vm7, %v116_v20, %v92_v62 }
  0xa9   :  { %v119_v25 = vsel %vm31_vm8, 0, %v117_v23 }
  0xaa   :  { %v96_v1 = vsub.s32 0, %v94_v0  ;;  %v123_v26 = vadd.s32 3, %v119_v25 }
  0xac   :  { %v152_v2 = vmin.u32 %v96_v1, %v94_v0  ;;  %v124_v27 = vand.u32 3, %v123_v26 }
  0xae   :  { %v98_v3 = vclz %v152_v2  ;;  %vm129_vm9 = vcmp.eq.s32.totalorder %v124_v27, 2  ;;  %vm126_vm10 = vcmp.eq.s32.totalorder %v124_v27, 0  ;;  %vm125_vm11 = vcmp.lt.s32.totalorder %v124_v27, 2 }
  0xb0   :  { %v153_v4 = vadd.s32 4294967294, %v98_v3 }
  0xb2   :  { %vm154_vm6 = vcmp.lt.s32.totalorder %v153_v4, 0 }
  0xb3   :  { %v101_v5 = vsel %vm154_vm6, 0, %v153_v4 }
  0xb4   :  { %v102_v9 = vsub.s32 32, %v101_v5  ;;  %v106_v10 = vsub.s32 4294967266, %v101_v5  ;;  %v103_v11 = vshll.u32 %v94_v0, %v101_v5 }
  0xb6   :  { %v104_v12 = vshrl.u32 %v86_v7, %v102_v9  ;;  %v107_v13 = vadd.s32 127, %v106_v10 }
  0xb8   :  { %v105_v14 = vor.u32 %v104_v12, %v103_v11  ;;  %v108_v15 = vshll.u32 %v107_v13, 23 }
  0xba   :  { %v109_v16 = vor.u32 4788187, %v108_v15  ;;  %v112_v18 = vcvt.s32.f32 %v105_v14 }
  0xbc   :  { %v110_v17 = vand.u32 2147483647, %v109_v16 }
  0xbe   :  { %v113_v19 = vmul.f32 %v112_v18, %v110_v17 }
  0xc0   :  { %v114_v21 = vxor.u32 2147483648, %v113_v19 }
  0xc2   :  { %v115_v22 = vsel %vm32_vm7, %v114_v21, %v113_v19 }
  0xc3   :  { %v118_v24 = vsel %vm31_vm8, %v228_v6, %v115_v22 }
  0xc4   :  { %168 = vcosq.f32 %v118_v24 }
  0xc5   :  { %170 = vsinq.f32 %v118_v24 }
  0xce   :  { %v169_v28 = vpop.eup %168 }
  0xcf   :  { %v171_v29 = vpop.eup %170  ;;  %v130_v30 = vxor.u32 2147483648, %v169_v28 }
  0xd0   :  { %v127_v31 = vxor.u32 2147483648, %v171_v29 }
  0xd1   :  { %v131_v32 = vsel %vm129_vm9, %v130_v30, %v171_v29 }
  0xd2   :  { %v128_v8 = vsel %vm126_vm10, %v169_v28, %v127_v31 }
  0xd3   :  { %v132_v33 = vsel %vm125_vm11, %v128_v8, %v131_v32 }
  0xd4   :  { %v133_v34 = vsel %vm122_vm12, nan, %v132_v33 }
  0xd5   :  { %134 = vst [vmem:[#allocation2] sm:$0xff] %v133_v34 }
  0xd6   :  { %183 = shalt.err (!%p180_p4)
}
  0xd7   :  { %s184_s18 = scalar_lea.hbm %s263_s2, 128 }
  0xd8   :  { %p185_p5 = scmp.ne.s32.totalorder %s263_s2, %s184_s18  ;;  %p188_p6 = scmp.lt.u32.totalorder %s184_s18, %s263_s2 }
  0xda   :  { %p190_p7 = pnand %p188_p6, %p185_p5 }
  0xdc   :  { %193 = shalt.err (!%p190_p7)
}
  0xdd   :  { %144 = dma.vmem_to_hbm [thread:$0]  %s142_s1, 128, %s263_s2, [#allocation3]  }
  0xde   :  { %194 = dma.done.wait [#allocation3], 128  }
  0xdf   :  { %195 = vsyncadd [#allocation3], 4294967168 }
  0xe0   :  { %148 = vsyncpa [#allocation3], 1 }

</bundles_post_ra>
